<compile_context>
chip_gen: v6e
topology: v6e:2x2x1
jax: 0.10.0
libtpu: 0.0.40
codegen_flags: <defaults>
</compile_context>

<pallas_src>
import jax
import jax.numpy as jnp
from jax.experimental import pallas as pl
from jax.experimental.pallas import tpu as pltpu


def iris_mlp_kernel(x_ref, w1_ref, b1_ref, w2_ref, b2_ref, o_ref):
    # x arrives as f32 straight from HBM; cast to bf16 here (cheap VPU op hidden
    # under the x DMA) instead of paying a separate XLA cast pass in the wrapper.
    x = x_ref[...].astype(w1_ref.dtype)
    # Layer 1 (block-diagonal packed): bf16 x bf16 -> f32 accumulate on the MXU.
    h = jnp.dot(x, w1_ref[...], preferred_element_type=jnp.float32)
    # Bias + ReLU in f32 on the VPU (no bf16 elementwise path needed -> v5e safe).
    h = jnp.maximum(h + b1_ref[...], 0.0)
    # Feed bf16 to the MXU only; accumulate layer 2 in f32.
    h = h.astype(w2_ref.dtype)
    out = jnp.dot(h, w2_ref[...], preferred_element_type=jnp.float32)
    o_ref[...] = (out + b2_ref[...]).astype(o_ref.dtype)


def _pack_params(w1, b1, w2, b2, pack, matmul_dtype):
    """Build block-diagonal weights and lane-tiled biases for pack factor P."""
    # kron(I_P, W) = blockdiag(W, ..., W): packed_x (rows, 4P) @ W1_bd -> (rows, 16P)
    # where packed column block j holds the result for original row g*P + j.
    w1_bd = jnp.kron(jnp.eye(pack, dtype=jnp.float32), w1).astype(matmul_dtype)
    w2_bd = jnp.kron(jnp.eye(pack, dtype=jnp.float32), w2).astype(matmul_dtype)
    b1_t = jnp.tile(b1.reshape(1, -1).astype(jnp.float32), (1, pack))
    b2_t = jnp.tile(b2.reshape(1, -1).astype(jnp.float32), (1, pack))
    return w1_bd, b1_t, w2_bd, b2_t


def iris_net_forward(x, w1, b1, w2, b2, *, pack=32, block_b=32768,
                     matmul_dtype=jnp.bfloat16, out_dtype=jnp.float32):
    """x: (B, 4) float32 -> (B, 3) out_dtype.

    Weights stored as (in_features, out_features) (transposed vs PyTorch) so the
    math is out = relu(x @ W1 + b1) @ W2 + b2.

    pack:    lane-packing factor P (32 is a good default on all generations;
             sweep {32, 64, 128} if tuning — keep it modest on v5e).
    block_b: batch-tile size in ORIGINAL rows; converted to packed rows below.
    """
    B, in_f = x.shape
    assert in_f == 4
    hid_f, out_f = 16, 3

    # Pad the batch to a multiple of the pack factor; padded rows are sliced off
    # at the end (rows are independent, so this is purely cosmetic work).
    b_pad = ((B + pack - 1) // pack) * pack
    if b_pad != B:
        x = jnp.pad(x, ((0, b_pad - B), (0, 0)))
    rows_p = b_pad // pack
    x_p = x.reshape(rows_p, in_f * pack)          # contiguous reshape: free

    # Packed-row tile. Use a full-array block when everything fits in one tile;
    # otherwise a multiple of 8 sublanes. NOTE: when rows_p % tb_p != 0 the last
    # partial tile relies on Pallas clipping out-of-range rows on writeback —
    # that is correct here because rows are independent (no cross-row reduction).
    tb_p = max(1, block_b // pack)
    if rows_p <= tb_p:
        tb_p = rows_p
    else:
        tb_p = max(8, (tb_p // 8) * 8)
    grid = (pl.cdiv(rows_p, tb_p),)

    w1_bd, b1_t, w2_bd, b2_t = _pack_params(w1, b1, w2, b2, pack, matmul_dtype)

    out_p = pl.pallas_call(
        iris_mlp_kernel,
        out_shape=jax.ShapeDtypeStruct((rows_p, out_f * pack), out_dtype),
        grid=grid,
        in_specs=[
            # x: streamed per batch tile (f32; cast to bf16 inside the kernel).
            pl.BlockSpec((tb_p, in_f * pack), lambda i: (i, 0)),
            # Parameters: constant index_maps + full-array blocks -> VMEM-resident
            # across all batch tiles.
            pl.BlockSpec((in_f * pack, hid_f * pack), lambda i: (0, 0)),
            pl.BlockSpec((1, hid_f * pack), lambda i: (0, 0)),
            pl.BlockSpec((hid_f * pack, out_f * pack), lambda i: (0, 0)),
            pl.BlockSpec((1, out_f * pack), lambda i: (0, 0)),
        ],
        out_specs=pl.BlockSpec((tb_p, out_f * pack), lambda i: (i, 0)),
        compiler_params=pltpu.CompilerParams(
            dimension_semantics=("parallel",),
            vmem_limit_bytes=48 * 1024 * 1024,
        ),
    )(x_p, w1_bd, b1_t, w2_bd, b2_t)

    # Unpack (contiguous reshape, free) and drop padded rows.
    return out_p.reshape(b_pad, out_f)[:B]


def init_params(key):
    """Mirror PyTorch nn.Linear default init: U(-1/sqrt(fan_in), +1/sqrt(fan_in))."""
    k1, k2, k3, k4 = jax.random.split(key, 4)
    bound1 = 1.0 / jnp.sqrt(4.0)
    bound2 = 1.0 / jnp.sqrt(16.0)
    w1 = jax.random.uniform(k1, (4, 16), jnp.float32, -bound1, bound1)
    b1 = jax.random.uniform(k2, (16,), jnp.float32, -bound1, bound1)
    w2 = jax.random.uniform(k3, (16, 3), jnp.float32, -bound2, bound2)
    b2 = jax.random.uniform(k4, (3,), jnp.float32, -bound2, bound2)
    return w1, b1, w2, b2


def reference(x, w1, b1, w2, b2, matmul_dtype=jnp.bfloat16):
    """Plain-JAX reference replicating the kernel's bf16-input / f32-accumulate math."""
    xb = x.astype(matmul_dtype).astype(jnp.float32)
    w1b = w1.astype(matmul_dtype).astype(jnp.float32)
    w2b = w2.astype(matmul_dtype).astype(jnp.float32)
    h = jnp.maximum(xb @ w1b + b1.reshape(1, -1), 0.0)
    hb = h.astype(matmul_dtype).astype(jnp.float32)
    return hb @ w2b + b2.reshape(1, -1)


if __name__ == "__main__":
    key = jax.random.PRNGKey(0)
    kp, kx1, kx2 = jax.random.split(key, 3)
    w1, b1, w2, b2 = init_params(kp)

    # Case 1: tiny batch consistent with the module (single packed tile, grid=1).
    x_small = jax.random.normal(kx1, (8, 4), jnp.float32)
    out_small = jax.block_until_ready(iris_net_forward(x_small, w1, b1, w2, b2))
    ref_small = reference(x_small, w1, b1, w2, b2)
    assert out_small.shape == (8, 3)
    assert jnp.allclose(out_small, ref_small, atol=1e-3, rtol=1e-3)
    # Loose check against pure-f32 math (bf16 MXU inputs lose ~3 significant digits;
    # acceptable at Iris scale — flag if exact f32 parity with PyTorch is required).
    ref_f32 = jnp.maximum(x_small @ w1 + b1.reshape(1, -1), 0.0) @ w2 + b2.reshape(1, -1)
    assert jnp.allclose(out_small, ref_f32, atol=3e-2, rtol=3e-2)

    # Case 2: exercise batch padding (1000 -> 1024) and a multi-step grid
    # (pack=32 -> 32 packed rows, tile of 8 packed rows -> 4 grid steps).
    x_big = jax.random.normal(kx2, (1000, 4), jnp.float32)
    out_big = jax.block_until_ready(
        iris_net_forward(x_big, w1, b1, w2, b2, block_b=256))
    ref_big = reference(x_big, w1, b1, w2, b2)
    assert out_big.shape == (1000, 3)
    assert jnp.allclose(out_big, ref_big, atol=1e-3, rtol=1e-3)

    print("KERNEL_OK")
</pallas_src>

<mosaic_0001>
module attributes {stable_mosaic.version = 11 : i64} {
  func.func @iris_mlp_kernel(%arg0: i32, %arg1: memref<1x128xf32, #tpu.memory_space<vmem>>, %arg2: memref<128x512xbf16, #tpu.memory_space<vmem>>, %arg3: memref<1x512xf32, #tpu.memory_space<vmem>>, %arg4: memref<512x96xbf16, #tpu.memory_space<vmem>>, %arg5: memref<1x96xf32, #tpu.memory_space<vmem>>, %arg6: memref<1x96xf32, #tpu.memory_space<vmem>>) attributes {dimension_semantics = [#tpu.dimension_semantics<parallel>], iteration_bounds = array<i64: 1>, scalar_prefetch = 0 : i64, scratch_operands = 0 : i64, tpu.core_type = #tpu.core_type<tc>, window_params = [{transform_indices = @transform_0, window_bounds = array<i64: 1, 128>}, {pipeline_mode = #tpu.pipeline_mode<synchronous>, transform_indices = @transform_1, window_bounds = array<i64: 128, 512>}, {pipeline_mode = #tpu.pipeline_mode<synchronous>, transform_indices = @transform_2, window_bounds = array<i64: 1, 512>}, {pipeline_mode = #tpu.pipeline_mode<synchronous>, transform_indices = @transform_3, window_bounds = array<i64: 512, 96>}, {pipeline_mode = #tpu.pipeline_mode<synchronous>, transform_indices = @transform_4, window_bounds = array<i64: 1, 96>}, {transform_indices = @transform_5, window_bounds = array<i64: 1, 96>}]} {
    %c0 = arith.constant 0 : index
    %c0_0 = arith.constant 0 : index
    %0 = vector.load %arg1[%c0, %c0_0] : memref<1x128xf32, #tpu.memory_space<vmem>>, vector<1x128xf32>
    %1 = arith.truncf %0 : vector<1x128xf32> to vector<1x128xbf16>
    %c0_1 = arith.constant 0 : index
    %c0_2 = arith.constant 0 : index
    %2 = vector.load %arg2[%c0_1, %c0_2] : memref<128x512xbf16, #tpu.memory_space<vmem>>, vector<128x512xbf16>
    %cst = arith.constant dense<0.000000e+00> : vector<1x512xf32>
    %3 = tpu.matmul %1, %2, %cst {dimension_numbers = #tpu.dot_dimension_numbers<[1], [0], [0], [1], [0, 0, 1, 1], [], []>} : vector<1x128xbf16>, vector<128x512xbf16>, vector<1x512xf32> -> vector<1x512xf32>
    %c0_3 = arith.constant 0 : index
    %c0_4 = arith.constant 0 : index
    %4 = vector.load %arg3[%c0_3, %c0_4] : memref<1x512xf32, #tpu.memory_space<vmem>>, vector<1x512xf32>
    %5 = arith.addf %3, %4 : vector<1x512xf32>
    %cst_5 = arith.constant 0.000000e+00 : f32
    %6 = vector.broadcast %cst_5 : f32 to vector<1x512xf32>
    %7 = arith.maximumf %5, %6 : vector<1x512xf32>
    %8 = arith.truncf %7 : vector<1x512xf32> to vector<1x512xbf16>
    %c0_6 = arith.constant 0 : index
    %c0_7 = arith.constant 0 : index
    %9 = vector.load %arg4[%c0_6, %c0_7] : memref<512x96xbf16, #tpu.memory_space<vmem>>, vector<512x96xbf16>
    %cst_8 = arith.constant dense<0.000000e+00> : vector<1x96xf32>
    %10 = tpu.matmul %8, %9, %cst_8 {dimension_numbers = #tpu.dot_dimension_numbers<[1], [0], [0], [1], [0, 0, 1, 1], [], []>} : vector<1x512xbf16>, vector<512x96xbf16>, vector<1x96xf32> -> vector<1x96xf32>
    %c0_9 = arith.constant 0 : index
    %c0_10 = arith.constant 0 : index
    %11 = vector.load %arg5[%c0_9, %c0_10] : memref<1x96xf32, #tpu.memory_space<vmem>>, vector<1x96xf32>
    %12 = arith.addf %10, %11 : vector<1x96xf32>
    %c0_11 = arith.constant 0 : index
    %c0_12 = arith.constant 0 : index
    %13 = vector.load %arg6[%c0_11, %c0_12] : memref<1x96xf32, #tpu.memory_space<vmem>>, vector<1x96xf32>
    tpu.vector_store %arg6[%c0_11, %c0_12], %12 {strides = array<i32>} : memref<1x96xf32, #tpu.memory_space<vmem>>, vector<1x96xf32>,
    return
  }
  func.func @transform_0(%arg0: i32) -> (i32, i32) {
    %c0_i32 = arith.constant 0 : i32
    %c0_i32_0 = arith.constant 0 : i32
    return %arg0, %c0_i32 : i32, i32
  }
  func.func @transform_1(%arg0: i32) -> (i32, i32) {
    %c0_i32 = arith.constant 0 : i32
    %c0_i32_0 = arith.constant 0 : i32
    %c0_i32_1 = arith.constant 0 : i32
    return %c0_i32, %c0_i32_0 : i32, i32
  }
  func.func @transform_2(%arg0: i32) -> (i32, i32) {
    %c0_i32 = arith.constant 0 : i32
    %c0_i32_0 = arith.constant 0 : i32
    %c0_i32_1 = arith.constant 0 : i32
    return %c0_i32, %c0_i32_0 : i32, i32
  }
  func.func @transform_3(%arg0: i32) -> (i32, i32) {
    %c0_i32 = arith.constant 0 : i32
    %c0_i32_0 = arith.constant 0 : i32
    %c0_i32_1 = arith.constant 0 : i32
    return %c0_i32, %c0_i32_0 : i32, i32
  }
  func.func @transform_4(%arg0: i32) -> (i32, i32) {
    %c0_i32 = arith.constant 0 : i32
    %c0_i32_0 = arith.constant 0 : i32
    %c0_i32_1 = arith.constant 0 : i32
    return %c0_i32, %c0_i32_0 : i32, i32
  }
  func.func @transform_5(%arg0: i32) -> (i32, i32) {
    %c0_i32 = arith.constant 0 : i32
    %c0_i32_0 = arith.constant 0 : i32
    return %arg0, %c0_i32 : i32, i32
  }
}

</mosaic_0001>

<bundles_post_ra>
// kernel: tpu_custom_call.1
= control target key start
LH: loop header
LB: loop body
LE: loop exit
PB: predicated region body
PF: predicated region fallthrough
CT: control target
= control target key end

     0   :  { %v893_v2 = vmov 0   ;;  %s1129_s0 = inlined_call_operand.vmem [shape: f32[1,128], index: 0, kind: input, shape index: {}]   ;;  %s1130_s1 = inlined_call_operand.vmem [shape: bf16[128,512], index: 1, kind: input, shape index: {}]   ;;  %s1131_s2 = inlined_call_operand.vmem [shape: f32[1,512], index: 2, kind: input, shape index: {}]   ;;  %s1132_s3 = inlined_call_operand.vmem [shape: bf16[512,96], index: 3, kind: input, shape index: {}]   ;;  %s1133_s4 = inlined_call_operand.vmem [shape: f32[1,96], index: 4, kind: input, shape index: {}]   ;;  %s1134_s5 = inlined_call_operand.hbm [shape: f32[1,96], index: 5, kind: output, shape index: {}]  }
   0x1   :  { %v791_v0 = vld [vmem:[%s1130_s1 + $0xe4] ss:$16 sps:$4 sm:$0xff]   ;;  %v793_v1 = vld [vmem:[%s1130_s1 + $0xec] ss:$16 sps:$4 sm:$0xff]   ;;  %270 = vmatprep.mubr.bf16.mxu0 %v893_v2  ;;  %311 = vmatprep.mubr.bf16.mxu1 %v893_v2  ;;  %v795_v3 = vld [vmem:[%s1130_s1 + $0xe0] ss:$16 sps:$4 sm:$0xff]  }
   0x2   :  { %238 = vmatprep.subr.bf16.mxu0 %v791_v0  ;;  %v796_v4 = vld [vmem:[%s1130_s1 + $0xe8] ss:$16 sps:$4 sm:$0xff]   ;;  %279 = vmatprep.subr.bf16.mxu1 %v793_v1  ;;  %v797_v5 = vld [vmem:[%s1130_s1 + $0xc4] ss:$16 sps:$4 sm:$0xff]   ;;  %v799_v6 = vld [vmem:[%s1130_s1 + $0xcc] ss:$16 sps:$4 sm:$0xff]  }
   0x3   :  { %239 = vmatpush1.bf16.msra.mxu0 %v795_v3  ;;  %280 = vmatpush1.bf16.msra.mxu1 %v796_v4  ;;  %v801_v7 = vld [vmem:[%s1130_s1 + $0xc0] ss:$16 sps:$4 sm:$0xff]   ;;  %v802_v8 = vld [vmem:[%s1130_s1 + $0xc8] ss:$16 sps:$4 sm:$0xff]   ;;  %v803_v9 = vld [vmem:[%s1130_s1 + $0xa4] ss:$16 sps:$4 sm:$0xff]  }
   0x4   :  { %240 = vmatprep.subr.bf16.mxu0 %v797_v5  ;;  %281 = vmatprep.subr.bf16.mxu1 %v799_v6  ;;  %v805_v10 = vld [vmem:[%s1130_s1 + $0xac] ss:$16 sps:$4 sm:$0xff]   ;;  %v807_v11 = vld [vmem:[%s1130_s1 + $0xa0] ss:$16 sps:$4 sm:$0xff]   ;;  %v808_v12 = vld [vmem:[%s1130_s1 + $0xa8] ss:$16 sps:$4 sm:$0xff]  }
   0x5   :  { %v809_v13 = vld [vmem:[%s1130_s1 + $0x84] ss:$16 sps:$4 sm:$0xff]   ;;  %v811_v14 = vld [vmem:[%s1130_s1 + $0x8c] ss:$16 sps:$4 sm:$0xff]   ;;  %v813_v15 = vld [vmem:[%s1130_s1 + $0x80] ss:$16 sps:$4 sm:$0xff]  }
   0x6   :  { %v814_v16 = vld [vmem:[%s1130_s1 + $0x88] ss:$16 sps:$4 sm:$0xff]   ;;  %v815_v17 = vld [vmem:[%s1130_s1 + $0x64] ss:$16 sps:$4 sm:$0xff]   ;;  %v817_v18 = vld [vmem:[%s1130_s1 + $0x6c] ss:$16 sps:$4 sm:$0xff]  }
   0x7   :  { %241 = vmatpush1.bf16.msra.mxu0 %v801_v7  ;;  %282 = vmatpush1.bf16.msra.mxu1 %v802_v8  ;;  %v819_v19 = vld [vmem:[%s1130_s1 + $0x60] ss:$16 sps:$4 sm:$0xff]   ;;  %v820_v20 = vld [vmem:[%s1130_s1 + $0x68] ss:$16 sps:$4 sm:$0xff]   ;;  %v821_v21 = vld [vmem:[%s1130_s1 + $0x44] ss:$16 sps:$4 sm:$0xff]  }
   0x8   :  { %242 = vmatprep.subr.bf16.mxu0 %v803_v9  ;;  %283 = vmatprep.subr.bf16.mxu1 %v805_v10  ;;  %v823_v22 = vld [vmem:[%s1130_s1 + $0x4c] ss:$16 sps:$4 sm:$0xff]   ;;  %v825_v23 = vld [vmem:[%s1130_s1 + $0x40] ss:$16 sps:$4 sm:$0xff]   ;;  %v826_v24 = vld [vmem:[%s1130_s1 + $0x48] ss:$16 sps:$4 sm:$0xff]  }
   0x9   :  { %v827_v25 = vld [vmem:[%s1130_s1 + $0x24] ss:$16 sps:$4 sm:$0xff]   ;;  %v829_v26 = vld [vmem:[%s1130_s1 + $0x2c] ss:$16 sps:$4 sm:$0xff]   ;;  %v831_v27 = vld [vmem:[%s1130_s1 + $0x20] ss:$16 sps:$4 sm:$0xff]  }
   0xa   :  { %v832_v28 = vld [vmem:[%s1130_s1 + $0x28] ss:$16 sps:$4 sm:$0xff]   ;;  %v833_v29 = vld [vmem:[%s1130_s1 + $0x4] ss:$16 sps:$4 sm:$0xff]   ;;  %v835_v30 = vld [vmem:[%s1130_s1 + $0xc] ss:$16 sps:$4 sm:$0xff]  }
   0xb   :  { %243 = vmatpush1.bf16.msra.mxu0 %v807_v11  ;;  %284 = vmatpush1.bf16.msra.mxu1 %v808_v12  ;;  %v837_v31 = vld [vmem:[%s1130_s1] ss:$16 sps:$4 sm:$0xff]   ;;  %v838_v32 = vld [vmem:[%s1130_s1 + $0x8] ss:$16 sps:$4 sm:$0xff]  }
   0xc   :  { %244 = vmatprep.subr.bf16.mxu0 %v809_v13  ;;  %285 = vmatprep.subr.bf16.mxu1 %v811_v14  ;;  %v22_v33 = vld [vmem:[%s1129_s0] sm:$0x1]  ;;  %v839_v34 = vld [vmem:[%s1132_s3 + $0x78] sm:$0xff]   ;;  %v843_v39 = vld [vmem:[%s1132_s3 + $0x70] sm:$0xff]  }
   0xd   :  { %v840_v35 = vld [vmem:[%s1132_s3 + $0xf8] sm:$0xff]   ;;  %v23_v37 = vpack.c.bf16 %v22_v33, %v22_v33  ;;  %v844_v40 = vld [vmem:[%s1132_s3 + $0xf0] sm:$0xff]   ;;  %v847_v43 = vld [vmem:[%s1132_s3 + $0x68] sm:$0xff]  }
   0xe   :  { %v841_v36 = vld [vmem:[%s1132_s3 + $0x38] sm:$0xff]   ;;  %v845_v41 = vld [vmem:[%s1132_s3 + $0x30] sm:$0xff]   ;;  %v848_v44 = vld [vmem:[%s1132_s3 + $0xe8] sm:$0xff]  }
   0xf   :  { %245 = vmatpush1.bf16.msra.mxu0 %v813_v15  ;;  %286 = vmatpush1.bf16.msra.mxu1 %v814_v16  ;;  %v842_v38 = vld [vmem:[%s1132_s3 + $0xb8] sm:$0xff]   ;;  %v846_v42 = vld [vmem:[%s1132_s3 + $0xb0] sm:$0xff]   ;;  %v849_v45 = vld [vmem:[%s1132_s3 + $0x28] sm:$0xff]  }
  0x10   :  { %246 = vmatprep.subr.bf16.mxu0 %v815_v17  ;;  %287 = vmatprep.subr.bf16.mxu1 %v817_v18  ;;  %v850_v46 = vld [vmem:[%s1132_s3 + $0xa8] sm:$0xff]   ;;  %v851_v47 = vld [vmem:[%s1132_s3 + $0x60] sm:$0xff]   ;;  %v855_v51 = vld [vmem:[%s1132_s3 + $0x58] sm:$0xff]  }
  0x11   :  { %v852_v48 = vld [vmem:[%s1132_s3 + $0xe0] sm:$0xff]   ;;  %v856_v52 = vld [vmem:[%s1132_s3 + $0xd8] sm:$0xff]   ;;  %v859_v55 = vld [vmem:[%s1132_s3 + $0x50] sm:$0xff]  }
  0x12   :  { %v853_v49 = vld [vmem:[%s1132_s3 + $0x20] sm:$0xff]   ;;  %v857_v53 = vld [vmem:[%s1132_s3 + $0x18] sm:$0xff]   ;;  %v860_v56 = vld [vmem:[%s1132_s3 + $0xd0] sm:$0xff]  }
  0x13   :  { %247 = vmatpush1.bf16.msra.mxu0 %v819_v19  ;;  %288 = vmatpush1.bf16.msra.mxu1 %v820_v20  ;;  %v854_v50 = vld [vmem:[%s1132_s3 + $0xa0] sm:$0xff]   ;;  %v858_v54 = vld [vmem:[%s1132_s3 + $0x98] sm:$0xff]  }
  0x14   :  { %248 = vmatprep.subr.bf16.mxu0 %v821_v21  ;;  %289 = vmatprep.subr.bf16.mxu1 %v823_v22 }
  0x17   :  { %249 = vmatpush1.bf16.msra.mxu0 %v825_v23  ;;  %290 = vmatpush1.bf16.msra.mxu1 %v826_v24 }
  0x18   :  { %250 = vmatprep.subr.bf16.mxu0 %v827_v25  ;;  %291 = vmatprep.subr.bf16.mxu1 %v829_v26 }
  0x1b   :  { %251 = vmatpush1.bf16.msra.mxu0 %v831_v27  ;;  %292 = vmatpush1.bf16.msra.mxu1 %v832_v28 }
  0x1c   :  { %252 = vmatprep.subr.bf16.mxu0 %v833_v29  ;;  %293 = vmatprep.subr.bf16.mxu1 %v835_v30 }
  0x1f   :  { %253 = vmatpush1.bf16.msra.mxu0 %v837_v31  ;;  %294 = vmatpush1.bf16.msra.mxu1 %v838_v32 }
  0x20   :  { %745 = vmatprep.subr.bf16.mxu0 %v839_v34  ;;  %767 = vmatprep.subr.bf16.mxu1 %v840_v35 }
  0x22   :  { %271 = vmatmul.mubr.bf16.vlgmr.msra.gmra.mxu0 %v23_v37  ;;  %312 = vmatmul.mubr.bf16.vlgmr.msra.gmra.mxu1 %v23_v37 }
  0x23   :  { %746 = vmatpush3.bf16.msra.mxu0 %v841_v36  ;;  %768 = vmatpush3.bf16.msra.mxu1 %v842_v38 }
  0x24   :  { %747 = vmatprep.subr.bf16.mxu0 %v843_v39  ;;  %769 = vmatprep.subr.bf16.mxu1 %v844_v40 }
  0x27   :  { %748 = vmatpush3.bf16.msra.mxu0 %v845_v41  ;;  %770 = vmatpush3.bf16.msra.mxu1 %v846_v42 }
  0x28   :  { %749 = vmatprep.subr.bf16.mxu0 %v847_v43  ;;  %771 = vmatprep.subr.bf16.mxu1 %v848_v44 }
  0x2b   :  { %750 = vmatpush3.bf16.msra.mxu0 %v849_v45  ;;  %772 = vmatpush3.bf16.msra.mxu1 %v850_v46 }
  0x2c   :  { %751 = vmatprep.subr.bf16.mxu0 %v851_v47  ;;  %773 = vmatprep.subr.bf16.mxu1 %v852_v48 }
  0x2f   :  { %752 = vmatpush3.bf16.msra.mxu0 %v853_v49  ;;  %774 = vmatpush3.bf16.msra.mxu1 %v854_v50 }
  0x30   :  { %753 = vmatprep.subr.bf16.mxu0 %v855_v51  ;;  %775 = vmatprep.subr.bf16.mxu1 %v856_v52 }
  0x31   :  { %10 = vsyncpa [#allocation3], 0  ;;  %v861_v57 = vld [vmem:[%s1132_s3 + $0x10] sm:$0xff]   ;;  %v863_v59 = vld [vmem:[%s1132_s3 + $0x48] sm:$0xff]   ;;  %v218_v3 = vlaneseq  ;;  %s894_s19 = smov [#allocation2]   ;;  %vm665_vm0 = vcmask 778240  }
  0x32   :  { %v862_v58 = vld [vmem:[%s1132_s3 + $0x90] sm:$0xff]   ;;  %v864_v60 = vld [vmem:[%s1132_s3 + $0xc8] sm:$0xff]   ;;  %v867_v63 = vld [vmem:[%s1132_s3 + $0x40] sm:$0xff]   ;;  %s673_s20 = sshll.u32 %s894_s19, 4  ;;  %s674_s20 = int_to_ptr.vmem [resolvable:$true] %s673_s20 }
  0x33   :  { %754 = vmatpush3.bf16.msra.mxu0 %v857_v53  ;;  %776 = vmatpush3.bf16.msra.mxu1 %v858_v54  ;;  %v865_v61 = vld [vmem:[%s1132_s3 + $0x8] sm:$0xff]   ;;  %v868_v0 = vld [vmem:[%s1132_s3 + $0xc0] sm:$0xff]   ;;  %v219_v4 = vshrl.u32 %v218_v3, 7  ;;  %s871_s21 = scalar_lea.vmem %s674_s20, 16  ;;  %s875_s22 = scalar_lea.vmem %s674_s20, 32 }
  0x34   :  { %755 = vmatprep.subr.bf16.mxu0 %v859_v55  ;;  %777 = vmatprep.subr.bf16.mxu1 %v860_v56  ;;  %v866_v62 = vld [vmem:[%s1132_s3 + $0x88] sm:$0xff]   ;;  %v869_v1 = vld [vmem:[%s1132_s3] sm:$0xff]   ;;  %p872_p0 = scmp.ne.s32.totalorder %s674_s20, %s871_s21  ;;  %p876_p1 = scmp.lt.s32.totalorder %s674_s20, %s674_s20 }
  0x35   :  { %v870_v2 = vld [vmem:[%s1132_s3 + $0x80] sm:$0xff]   ;;  %v220_v5 = vsub.s32 0, %v219_v4  ;;  %v228_v6 = vsub.s32 2, %v219_v4  ;;  %v224_v8 = vsub.s32 1, %v219_v4  ;;  %v232_v9 = vsub.s32 3, %v219_v4  ;;  %p877_p2 = scmp.lt.s32.totalorder %s875_s22, %s871_s21 }
  0x36   :  { %v56_v7 = vld [vmem:[%s1131_s2] sm:$0xf] }
  0x37   :  { %756 = vmatpush3.bf16.msra.mxu0 %v861_v57  ;;  %778 = vmatpush3.bf16.msra.mxu1 %v862_v58  ;;  %v221_v10 = vrot.slane %v56_v7, %v220_v5  ;;  %v229_v11 = vrot.slane %v56_v7, %v228_v6  ;;  %v225_v12 = vrot.slane %v56_v7, %v224_v8  ;;  %v392_v36 = vld [vmem:[%s1133_s4] sm:$0x1]  ;;  %p878_p3 = por %p877_p2, %p876_p1 }
  0x38   :  { %757 = vmatprep.subr.bf16.mxu0 %v863_v59  ;;  %779 = vmatprep.subr.bf16.mxu1 %v864_v60  ;;  %v233_v13 = vrot.slane %v56_v7, %v232_v9 }
  0x39   :  { %p879_p4 = pnand %p878_p3, %p872_p0 }
  0x3b   :  { %758 = vmatpush3.bf16.msra.mxu0 %v865_v61  ;;  %780 = vmatpush3.bf16.msra.mxu1 %v866_v62 }
  0x3c   :  { %759 = vmatprep.subr.bf16.mxu0 %v867_v63  ;;  %781 = vmatprep.subr.bf16.mxu1 %v868_v0 }
  0x3f   :  { %760 = vmatpush3.bf16.msra.mxu0 %v869_v1  ;;  %782 = vmatpush3.bf16.msra.mxu1 %v870_v2 }
  0xe2   :  { %v272_v14 = vpop.f32.mrf.mxu0  ;;  %v313_v15 = vpop.f32.mrf.mxu1 }
  0xe3   :  { %v273_v16 = vadd.f32 %v272_v14, %v221_v10  ;;  %v314_v17 = vadd.f32 %v313_v15, %v229_v11 }
  0xe4   :  { %v274_v18 = vpop.f32.mrf.mxu0  ;;  %v315_v19 = vpop.f32.mrf.mxu1 }
  0xe5   :  { %v322_v20 = vmax.f32 %v314_v17, 0.0  ;;  %v275_v21 = vadd.f32 %v274_v18, %v225_v12  ;;  %v316_v22 = vadd.f32 %v315_v19, %v233_v13  ;;  %v320_v23 = vmax.f32 %v273_v16, 0.0 }
  0xe6   :  { %v276_v24 = vpop.f32.mrf.mxu0  ;;  %v317_v25 = vpop.f32.mrf.mxu1 }
  0xe7   :  { %v321_v26 = vmax.f32 %v275_v21, 0.0  ;;  %v323_v27 = vmax.f32 %v316_v22, 0.0  ;;  %v326_v28 = vpack.c.bf16 %v322_v20, %v322_v20  ;;  %v324_v33 = vpack.c.bf16 %v320_v23, %v320_v23 }
  0xe8   :  { %v277_v29 = vpop.f32.mrf.mxu0  ;;  %v318_v30 = vpop.f32.mrf.mxu1 }
  0xe9   :  { %v325_v31 = vpack.c.bf16 %v321_v26, %v321_v26  ;;  %v327_v32 = vpack.c.bf16 %v323_v27, %v323_v27 }
  0xeb   :  { %617 = vmatprep.mubr.bf16.mxu0 %v325_v31  ;;  %657 = vmatprep.mubr.bf16.mxu1 %v327_v32 }
  0xec   :  { %618 = vmatmul.mubr.bf16.vlgmr.msra.gmra.mxu0 %v324_v33  ;;  %658 = vmatmul.mubr.bf16.vlgmr.msra.gmra.mxu1 %v326_v28 }
 0x1ac   :  { %v761_v34 = vpop.f32.mrf.mxu0  ;;  %v783_v35 = vpop.f32.mrf.mxu1 }
 0x1ae   :  { %v762_v37 = vpop.f32.mrf.mxu0  ;;  %v784_v38 = vpop.f32.mrf.mxu1 }
 0x1af   :  { %v763_v39 = vadd.f32 %v762_v37, %v761_v34  ;;  %v785_v43 = vadd.f32 %v784_v38, %v783_v35 }
 0x1b0   :  { %v764_v40 = vpop.f32.mrf.mxu0  ;;  %v786_v41 = vpop.f32.mrf.mxu1 }
 0x1b1   :  { %v620_v42 = vadd.f32 %v763_v39, %v392_v36 }
 0x1b2   :  { %v765_v44 = vpop.f32.mrf.mxu0  ;;  %v787_v45 = vpop.f32.mrf.mxu1 }
 0x1b3   :  { %v660_v46 = vadd.f32 %v785_v43, %v620_v42 }
 0x1b5   :  { %666 = vst.msk [vmem:[#allocation2] sm:$0x1] %vm665_vm0, %v660_v46 }
 0x1b6   :  { %882 = shalt.err (!%p879_p4)
}
 0x1b7   :  { %676 = dma.vmem_to_hbm [thread:$0]  %s674_s20, 16, %s1134_s5, [#allocation3]  }
 0x1b8   :  { %891 = dma.done.wait [#allocation3], 16  }
 0x1b9   :  { %892 = vsyncadd [#allocation3], 4294967280 }
 0x1ba   :  { %680 = vsyncpa [#allocation3], 1 }

</bundles_post_ra>
